<compile_context>
chip_gen: v7x
topology: tpu7x:2x2x1
jax: 0.10.0
libtpu: 0.0.40
codegen_flags: <defaults>
</compile_context>

<pallas_src>
import functools

import jax
import jax.numpy as jnp
from jax import lax
from jax.experimental import pallas as pl
from jax.experimental.pallas import tpu as pltpu

_MIB = 1024 * 1024


def _round_up(x, m):
    return ((x + m - 1) // m) * m


def _vmem_capacity_bytes():
    """Physical per-core VMEM (64 MiB v7x, 128 MiB v5e/v6e); conservative
    64 MiB fallback if the query is unavailable."""
    try:
        cap = int(pltpu.get_tpu_info().vmem_capacity_bytes)
        if cap > 0:
            return cap
    except Exception:
        pass
    return 64 * _MIB


# ---------------------------------------------------------------------------
# Fused single-pass kernel
# ---------------------------------------------------------------------------
def _fused_kernel(gamma_ref, x_ref, o_ref, *, compute_dtype, approx_recip):
    """out_rows = gamma * (softmax(rowmax(E)-E)_rows @ X) + X_rows, E = X X^T."""
    c_total = x_ref.shape[1]
    tc = o_ref.shape[1]

    x_all_raw = x_ref[0]                                   # (C, N), input dtype
    x_all = x_all_raw.astype(compute_dtype)
    if tc == c_total:
        x_rows_raw = x_all_raw
        x_rows = x_all
    else:
        start = pl.multiple_of(pl.program_id(1) * tc, tc)  # tc % 8 == 0
        x_rows_raw = x_ref[0, pl.ds(start, tc), :]         # (tc, N)
        x_rows = x_rows_raw.astype(compute_dtype)

    # energy rows = X_rows @ X^T : contract the N axis of both operands on the
    # MXU directly (no materialized transpose / XLU pass).
    energy = lax.dot_general(x_rows, x_all, (((1,), (1,)), ((), ())),
                             preferred_element_type=jnp.float32)      # (tc, C)
    # softmax(rowmax(E) - E) == exp(rowmin(E) - E) / sum  (single row reduce,
    # exponents <= 0, numerically stable).
    row_min = jnp.min(energy, axis=-1, keepdims=True)
    p = jnp.exp(row_min - energy)
    denom = jnp.sum(p, axis=-1, keepdims=True)
    attn = p * pl.reciprocal(denom, approx=approx_recip)

    out = jnp.dot(attn.astype(compute_dtype), x_all,
                  preferred_element_type=jnp.float32)                 # (tc, N)
    gamma = gamma_ref[0]
    o_ref[0] = (gamma * out + x_rows_raw.astype(jnp.float32)).astype(o_ref.dtype)


def _fused_plan(C, N, x_dtype, compute_dtype, vmem_cap):
    """Pick the fused row-block size tc (None if the fused kernel won't fit)."""
    x_sz = jnp.dtype(x_dtype).itemsize
    c_sz = jnp.dtype(compute_dtype).itemsize
    needs_cast = jnp.dtype(compute_dtype) != jnp.dtype(x_dtype)
    budget = int(0.70 * vmem_cap)

    def est(tc):
        return (2 * C * N * x_sz                         # x block (double-buffered)
                + 2 * tc * N * x_sz                      # out block (double-buffered)
                + (C * N * c_sz if needs_cast else 0)    # cast copy of X
                + (tc * N * c_sz if needs_cast else 0)   # cast copy of the rows
                + 2 * tc * N * 4                         # fp32 matmul result + residual
                + 4 * tc * C * 4)                        # energy / softmax temps

    candidates = []
    r = 1
    while r <= C:
        if C % r == 0:
            tc = C // r
            if tc == C or tc % 8 == 0:                   # sublane-aligned row blocks
                candidates.append(tc)
        r *= 2
    fitting = [tc for tc in candidates if est(tc) <= budget]
    if not fitting:
        return None, None
    tc = max(fitting)
    if tc == C:
        # prefer >= 2 row blocks so both v7x TensorCores get work even at B == 1
        smaller = [t for t in fitting if t < C]
        if smaller:
            tc = max(smaller)
    return tc, est(tc)


# ---------------------------------------------------------------------------
# Two-pass streaming fallback
# ---------------------------------------------------------------------------
def _attention_kernel(*refs, compute_dtype, approx_recip, n_valid, emit_xk):
    """Pass 1: accumulate energy = X X^T over N chunks; finish the softmax on
    the last chunk (gamma folded in); optionally emit a compute-dtype X copy."""
    if emit_xk:
        gamma_ref, x_ref, attn_ref, xk_ref, energy_acc = refs
    else:
        gamma_ref, x_ref, attn_ref, energy_acc = refs

    k = pl.program_id(1)
    tn = x_ref.shape[2]

    @pl.when(k == 0)
    def _():
        energy_acc[...] = jnp.zeros_like(energy_acc)

    x = x_ref[0]                                            # (C, tn)
    if n_valid % tn:
        # Ragged final chunk: zero the out-of-range columns in-kernel instead
        # of paying a full-tensor jnp.pad / slice round-trip in HBM.
        col = lax.broadcasted_iota(jnp.int32, (1, tn), 1) + k * tn
        x = jnp.where(col < n_valid, x, jnp.zeros_like(x))
    xc = x.astype(compute_dtype)
    energy_acc[...] += lax.dot_general(xc, xc, (((1,), (1,)), ((), ())),
                                       preferred_element_type=jnp.float32)
    if emit_xk:
        xk_ref[0] = xc          # compute-dtype X, re-read (half the bytes) by pass 2

    @pl.when(k == pl.num_programs(1) - 1)
    def _():
        energy = energy_acc[...]
        row_min = jnp.min(energy, axis=-1, keepdims=True)
        p = jnp.exp(row_min - energy)
        denom = jnp.sum(p, axis=-1, keepdims=True)
        # gamma folded into the attention tensor: pass 2 is just A @ X + X.
        scale = gamma_ref[0] * pl.reciprocal(denom, approx=approx_recip)
        attn_ref[0] = (p * scale).astype(attn_ref.dtype)


def _apply_kernel(attn_ref, x_ref, o_ref, *, compute_dtype):
    """Pass 2: out_chunk = (gamma*attention) @ X_chunk + X_chunk."""
    x = x_ref[0]
    out = jnp.dot(attn_ref[0].astype(compute_dtype), x.astype(compute_dtype),
                  preferred_element_type=jnp.float32)
    o_ref[0] = (out + x.astype(jnp.float32)).astype(o_ref.dtype)


def _pick_tn(C, N, x_dtype, compute_dtype, vmem_cap):
    """N tile for the fallback: as large as fits ~45% of VMEM, capped at 4096
    (v5e/v6e, 128 MiB VMEM) / 2048 (v7x, 64 MiB VMEM).  Never has to divide N."""
    x_sz = jnp.dtype(x_dtype).itemsize
    c_sz = jnp.dtype(compute_dtype).itemsize
    gen_cap = 4096 if vmem_cap >= 96 * _MIB else 2048
    budget = int(0.45 * vmem_cap)

    def footprint(t):
        p1 = (2 * C * t * x_sz + 2 * C * C * c_sz + 2 * C * t * c_sz
              + C * C * 4 + C * t * c_sz + 2 * C * C * 4)
        p2 = (2 * C * C * c_sz + 2 * C * t * max(x_sz, c_sz)
              + 2 * C * t * x_sz + C * t * 4)
        return max(p1, p2)

    tn = min(gen_cap, _round_up(N, 128))
    while tn > 128 and footprint(tn) > budget:
        tn -= 128
    return min(tn, N)   # tn == N (full dim) is always a legal block size


# ---------------------------------------------------------------------------
# Wrapper
# ---------------------------------------------------------------------------
def cam_module(x, gamma, *, compute_dtype=None, approx_recip=True,
               force_two_pass=False, force_tn=None):
    """Channel-attention forward (CAM_Module.forward).

    x:             (B, C, H, W)
    gamma:         (1,) learnable scale (PyTorch init: zeros(1)).
    compute_dtype: dtype of the MXU operands.  jnp.bfloat16 is the recommended
                   fast path on v6e/v7x (fp32 accumulation either way); None
                   keeps x.dtype (exact PyTorch semantics).
    force_two_pass / force_tn: testing knobs for the streaming fallback.
    """
    B, C, H, W = x.shape
    N = H * W
    x_dtype = jnp.dtype(x.dtype)
    compute_dtype = x_dtype if compute_dtype is None else jnp.dtype(compute_dtype)
    x_flat = x.reshape(B, C, N)
    gamma = jnp.asarray(gamma, dtype=jnp.float32).reshape((1,))

    vmem_cap = _vmem_capacity_bytes()
    vmem_ceiling = int(0.85 * vmem_cap)   # headroom: never request 100% (v7x = 64 MiB)

    # --------------------- fused single-pass path ---------------------
    tc, fused_est = ((None, None) if force_two_pass
                     else _fused_plan(C, N, x_dtype, compute_dtype, vmem_cap))
    if tc is not None:
        num_r = C // tc
        vmem_limit = min(vmem_ceiling, max(32 * _MIB, int(1.25 * fused_est)))
        out_flat = pl.pallas_call(
            functools.partial(_fused_kernel, compute_dtype=compute_dtype,
                              approx_recip=approx_recip),
            out_shape=jax.ShapeDtypeStruct((B, C, N), x_dtype),
            grid_spec=pltpu.PrefetchScalarGridSpec(
                num_scalar_prefetch=0,
                grid=(B, num_r),
                in_specs=[
                    pl.BlockSpec(memory_space=pltpu.MemorySpace.SMEM),   # gamma
                    pl.BlockSpec((1, C, N), lambda b, r: (b, 0, 0)),     # x[b]
                ],
                out_specs=pl.BlockSpec((1, tc, N), lambda b, r: (b, r, 0)),
            ),
            compiler_params=pltpu.CompilerParams(
                dimension_semantics=("parallel", "parallel"),
                vmem_limit_bytes=vmem_limit),
        )(gamma, x_flat)
        return out_flat.reshape(B, C, H, W)

    # --------------------- two-pass streaming fallback ---------------------
    x_sz = x_dtype.itemsize
    c_sz = compute_dtype.itemsize
    if force_tn is not None:
        tn = min(int(force_tn), N)
    else:
        tn = _pick_tn(C, N, x_dtype, compute_dtype, vmem_cap)
    num_k = pl.cdiv(N, tn)
    emit_xk = compute_dtype != x_dtype   # share a compute-dtype X with pass 2

    p1_est = (2 * C * tn * x_sz + 2 * C * C * c_sz
              + (2 * C * tn * c_sz if emit_xk else 0)
              + C * C * 4 + C * tn * c_sz + 2 * C * C * 4)
    p2_in_sz = c_sz if emit_xk else x_sz
    p2_est = (2 * C * C * c_sz + 2 * C * tn * p2_in_sz
              + 2 * C * tn * x_sz + C * tn * 4)
    p1_vmem = min(vmem_ceiling, max(32 * _MIB, int(1.5 * p1_est)))
    p2_vmem = min(vmem_ceiling, max(32 * _MIB, int(1.5 * p2_est)))

    # ---- pass 1: attention = gamma * softmax(rowmax(E) - E), E = X X^T ----
    # NOTE: pass 1 keeps grid (B, K); a further C-row split (megacore at B==1)
    # is only worthwhile at the very large sizes that bypass the fused path.
    p1_out_shape = [jax.ShapeDtypeStruct((B, C, C), compute_dtype)]
    p1_out_specs = [pl.BlockSpec((1, C, C), lambda b, k: (b, 0, 0))]
    if emit_xk:
        p1_out_shape.append(jax.ShapeDtypeStruct((B, C, N), compute_dtype))
        p1_out_specs.append(pl.BlockSpec((1, C, tn), lambda b, k: (b, 0, k)))

    p1_out = pl.pallas_call(
        functools.partial(_attention_kernel, compute_dtype=compute_dtype,
                          approx_recip=approx_recip, n_valid=N, emit_xk=emit_xk),
        out_shape=tuple(p1_out_shape),
        grid_spec=pltpu.PrefetchScalarGridSpec(
            num_scalar_prefetch=0,
            grid=(B, num_k),
            in_specs=[
                pl.BlockSpec(memory_space=pltpu.MemorySpace.SMEM),    # gamma
                pl.BlockSpec((1, C, tn), lambda b, k: (b, 0, k)),     # x chunk
            ],
            out_specs=tuple(p1_out_specs),
            scratch_shapes=[pltpu.VMEM((C, C), jnp.float32)],
        ),
        compiler_params=pltpu.CompilerParams(
            dimension_semantics=("parallel", "arbitrary"),
            vmem_limit_bytes=p1_vmem),
    )(gamma, x_flat)
    attention = p1_out[0]
    x_apply = p1_out[1] if emit_xk else x_flat

    # ---------- pass 2: out = (gamma*attention) @ X + X ----------
    out_flat = pl.pallas_call(
        functools.partial(_apply_kernel, compute_dtype=compute_dtype),
        out_shape=jax.ShapeDtypeStruct((B, C, N), x_dtype),
        grid_spec=pltpu.PrefetchScalarGridSpec(
            num_scalar_prefetch=0,
            grid=(B, num_k),
            in_specs=[
                pl.BlockSpec((1, C, C), lambda b, k: (b, 0, 0)),      # gamma*attn
                pl.BlockSpec((1, C, tn), lambda b, k: (b, 0, k)),     # X chunk
            ],
            out_specs=pl.BlockSpec((1, C, tn), lambda b, k: (b, 0, k)),
        ),
        compiler_params=pltpu.CompilerParams(
            dimension_semantics=("parallel", "parallel"),
            vmem_limit_bytes=p2_vmem),
    )(attention, x_apply)

    return out_flat.reshape(B, C, H, W)


# ---------------------------------------------------------------------------
# Pure-JAX reference (mirrors CAM_Module.forward)
# ---------------------------------------------------------------------------
def cam_reference(x, gamma, compute_dtype=None, residual_rounded=False):
    B, C, H, W = x.shape
    xf = x.reshape(B, C, H * W).astype(jnp.float32)
    rounds = (compute_dtype is not None
              and jnp.dtype(compute_dtype) != jnp.dtype(jnp.float32))
    xc = xf.astype(compute_dtype).astype(jnp.float32) if rounds else xf
    energy = jnp.einsum("bcn,bdn->bcd", xc, xc)
    energy_new = jnp.max(energy, axis=-1, keepdims=True) - energy
    attention = jax.nn.softmax(energy_new, axis=-1)
    if rounds:
        attention = attention.astype(compute_dtype).astype(jnp.float32)
    out = jnp.einsum("bcd,bdn->bcn", attention, xc)
    res = xc if residual_rounded else xf
    out = gamma[0] * out + res
    return out.reshape(B, C, H, W)


if __name__ == "__main__":
    key = jax.random.PRNGKey(0)
    # Module __init__ sets gamma = zeros(1); use a nonzero value so the
    # attention path actually contributes to the output.
    gamma = jnp.array([0.5], dtype=jnp.float32)

    # 1) fused path, strict fp32 (exact PyTorch semantics)
    x1 = jax.random.normal(key, (2, 4, 16, 16), dtype=jnp.float32)
    out1 = jax.block_until_ready(
        cam_module(x1, gamma, compute_dtype=jnp.float32, approx_recip=False))
    ref1 = cam_reference(x1, gamma)
    assert out1.shape == x1.shape
    assert jnp.allclose(out1, ref1, atol=1e-4, rtol=1e-4), "fused fp32 mismatch"

    # 2) fused path, bf16 fast path (fp32 accumulation, approx reciprocal)
    out2 = jax.block_until_ready(cam_module(x1, gamma, compute_dtype=jnp.bfloat16))
    ref2 = cam_reference(x1, gamma, compute_dtype=jnp.bfloat16)
    assert jnp.allclose(out2, ref2, atol=2e-2, rtol=2e-2), "fused bf16 mismatch"

    # 3) fused path with megacore row split (C=16 -> two 8-row blocks) and a
    #    spatial size that is not a multiple of 128 (N = 81, full-dim block).
    x3 = jax.random.normal(jax.random.PRNGKey(1), (1, 16, 9, 9), dtype=jnp.float32)
    out3 = jax.block_until_ready(
        cam_module(x3, gamma, compute_dtype=jnp.float32, approx_recip=False))
    ref3 = cam_reference(x3, gamma)
    assert jnp.allclose(out3, ref3, atol=1e-4, rtol=1e-4), "fused row-split mismatch"

    # 4) two-pass fallback (forced): ragged N (225) handled by in-kernel
    #    masking of the final chunk, no jnp.pad / slice.
    x4 = jax.random.normal(jax.random.PRNGKey(2), (2, 8, 15, 15), dtype=jnp.float32)
    out4 = jax.block_until_ready(
        cam_module(x4, gamma, compute_dtype=jnp.float32, approx_recip=False,
                   force_two_pass=True, force_tn=128))
    ref4 = cam_reference(x4, gamma)
    assert jnp.allclose(out4, ref4, atol=1e-4, rtol=1e-4), "two-pass fp32 mismatch"

    # 5) two-pass fallback, bf16 fast path: pass 1 emits a bf16 copy of X that
    #    pass 2 (and its residual) reuse.
    out5 = jax.block_until_ready(
        cam_module(x4, gamma, compute_dtype=jnp.bfloat16,
                   force_two_pass=True, force_tn=128))
    ref5 = cam_reference(x4, gamma, compute_dtype=jnp.bfloat16,
                         residual_rounded=True)
    assert jnp.allclose(out5, ref5, atol=2e-2, rtol=2e-2), "two-pass bf16 mismatch"

    print("KERNEL_OK")
</pallas_src>

<mosaic_0001>
module attributes {stable_mosaic.version = 11 : i64} {
  func.func @_fused_kernel(%arg0: i32, %arg1: i32, %arg2: memref<1xf32, #tpu.memory_space<smem>>, %arg3: memref<1x4x256xf32, #tpu.memory_space<vmem>>, %arg4: memref<1x4x256xf32, #tpu.memory_space<vmem>>) attributes {dimension_semantics = [#tpu.dimension_semantics<parallel>, #tpu.dimension_semantics<parallel>], iteration_bounds = array<i64: 2, 1>, scalar_prefetch = 0 : i64, scratch_operands = 0 : i64, tpu.core_type = #tpu.core_type<tc>, window_params = [{transform_indices = @transform_0, window_bounds = array<i64: 1>}, {transform_indices = @transform_1, window_bounds = array<i64: 1, 4, 256>}, {transform_indices = @transform_2, window_bounds = array<i64: 1, 4, 256>}]} {
    %c0 = arith.constant 0 : index
    %c0_0 = arith.constant 0 : index
    %c0_1 = arith.constant 0 : index
    %0 = vector.load %arg3[%c0, %c0_0, %c0_1] : memref<1x4x256xf32, #tpu.memory_space<vmem>>, vector<1x4x256xf32>
    %1 = vector.shape_cast %0 : vector<1x4x256xf32> to vector<4x256xf32>
    %cst = arith.constant dense<0.000000e+00> : vector<4x4xf32>
    %2 = tpu.matmul %1, %1, %cst {dimension_numbers = #tpu.dot_dimension_numbers<[1], [1], [0], [0], [0, 0, 1, 0], [], []>} : vector<4x256xf32>, vector<4x256xf32>, vector<4x4xf32> -> vector<4x4xf32>
    %cst_2 = arith.constant dense<0x7F800000> : vector<4xf32>
    %3 = vector.multi_reduction <minimumf>, %2, %cst_2 [1] : vector<4x4xf32> to vector<4xf32>
    %4 = vector.shape_cast %3 : vector<4xf32> to vector<4x1xf32>
    %5 = vector.broadcast %4 : vector<4x1xf32> to vector<4x4xf32>
    %6 = arith.subf %5, %2 : vector<4x4xf32>
    %7 = math.exp %6 : vector<4x4xf32>
    %cst_3 = arith.constant dense<0.000000e+00> : vector<4xf32>
    %8 = vector.multi_reduction <add>, %7, %cst_3 [1] : vector<4x4xf32> to vector<4xf32>
    %9 = vector.shape_cast %8 : vector<4xf32> to vector<4x1xf32>
    %10 = tpu.reciprocal %9 : vector<4x1xf32> -> vector<4x1xf32>
    %11 = vector.broadcast %10 : vector<4x1xf32> to vector<4x4xf32>
    %12 = arith.mulf %7, %11 : vector<4x4xf32>
    %cst_4 = arith.constant dense<0.000000e+00> : vector<4x256xf32>
    %13 = tpu.matmul %12, %1, %cst_4 {dimension_numbers = #tpu.dot_dimension_numbers<[1], [0], [0], [1], [0, 0, 1, 1], [], []>} : vector<4x4xf32>, vector<4x256xf32>, vector<4x256xf32> -> vector<4x256xf32>
    %c0_5 = arith.constant 0 : index
    %14 = memref.load %arg2[%c0_5] : memref<1xf32, #tpu.memory_space<smem>>
    %15 = vector.broadcast %14 : f32 to vector<4x256xf32>
    %16 = arith.mulf %15, %13 : vector<4x256xf32>
    %17 = arith.addf %16, %1 : vector<4x256xf32>
    %c0_6 = arith.constant 0 : index
    %c0_7 = arith.constant 0 : index
    %c0_8 = arith.constant 0 : index
    %18 = vector.load %arg4[%c0_6, %c0_7, %c0_8] : memref<1x4x256xf32, #tpu.memory_space<vmem>>, vector<1x4x256xf32>
    %19 = vector.shape_cast %18 : vector<1x4x256xf32> to vector<4x256xf32>
    %20 = vector.shape_cast %17 : vector<4x256xf32> to vector<1x4x256xf32>
    tpu.vector_store %arg4[%c0_6, %c0_7, %c0_8], %20 {strides = array<i32>} : memref<1x4x256xf32, #tpu.memory_space<vmem>>, vector<1x4x256xf32>,
    return
  }
  func.func @transform_0(%arg0: i32, %arg1: i32) -> i32 {
    %c0_i32 = arith.constant 0 : i32
    %c0_i32_0 = arith.constant 0 : i32
    return %c0_i32 : i32
  }
  func.func @transform_1(%arg0: i32, %arg1: i32) -> (i32, i32, i32) {
    %c0_i32 = arith.constant 0 : i32
    %c0_i32_0 = arith.constant 0 : i32
    %c0_i32_1 = arith.constant 0 : i32
    return %arg0, %c0_i32, %c0_i32_0 : i32, i32, i32
  }
  func.func @transform_2(%arg0: i32, %arg1: i32) -> (i32, i32, i32) {
    %c0_i32 = arith.constant 0 : i32
    %c0_i32_0 = arith.constant 0 : i32
    return %arg0, %arg1, %c0_i32 : i32, i32, i32
  }
}

</mosaic_0001>

<bundles_post_ra>
// kernel: tpu_custom_call.1
= control target key start
LH: loop header
LB: loop body
LE: loop exit
PB: predicated region body
PF: predicated region fallthrough
CT: control target
= control target key end

     0   :  { %s849_s0 = inlined_call_operand.<no memory space> [shape: f32[1], index: 0, kind: input, shape index: {}]   ;;  %s850_s1 = inlined_call_operand.hbm [shape: f32[2,4,256], index: 1, kind: input, shape index: {}]   ;;  %s851_s2 = inlined_call_operand.hbm [shape: f32[2,4,256], index: 2, kind: output, shape index: {}]  }
   0x1   :  { %7 = sst [smem:[#allocation2]] %s849_s0 }
   0x2   :  { %8 = vsyncpa [#allocation4], 0 }
   0x3   :  { %10 = vsyncpa [#allocation4 + $0x1], 0 }
   0x4   :  { %11 = vsyncpa [#allocation5], 0 }
   0x5   :  { %13 = vsyncpa [#allocation5 + $0x1], 0  ;;  %s673_s11 = smov 0   ;;  %s675_s12 = smov 0  }
   0x6   :  { %s677_s13 = smov 0   ;;  %s679_s14 = smov 0  }
   0x7   :  { %s681_s15 = smov 0   ;;  %s683_s16 = smov 0  }
   0x8 LB: > { %s450_s0 = sadd.s32 4294967295, %s650_s16   ;;  %s451_s17 = sadd.s32 4294967294, %s650_s16   ;;  %s650_s16 = sphi %s683_s16, %s19_s16   ;;  %s646_s15 = sphi %s681_s15, %s867_s15   ;;  %s642_s14 = sphi %s679_s14, %s866_s14   ;;  %s638_s13 = sphi %s677_s13, %s865_s13   ;;  %s634_s12 = sphi %s675_s12, %s864_s12   ;;  %s630_s11 = sphi %s673_s11, %s863_s11  }
   0x9   : > { %s31_s18 = sadd.s32 1, %s646_s15  ;;  %s59_s19 = sadd.s32 1, %s638_s13 }
   0xa   : > { %p33_p0 = scmp.ge.s32.totalorder %s31_s18, 2  ;;  %p66_p1 = scmp.ne.s32.totalorder %s638_s13, %s634_s12 }
   0xb   : > { %p67_p2 = scmp.eq.s32.totalorder %s650_s16, 0  ;;  %p72_p3 = scmp.ne.s32.totalorder %s634_s12, %s630_s11 }
   0xc   : > { %s869_s18 = smov (%p33_p0, %s31_s18), 0  ;;  %p73_p5 = scmp.eq.s32.totalorder %s450_s0, 0 }
   0xd   : > { %p714_p4 = por %p67_p2, %p66_p1  ;;  %s56_s21 = ssub.s32 %s646_s15, %s869_s18 }
   0xe   : > { %p98_p6 = scmp.eq.s32.totalorder %s450_s0, 1  ;;  %p57_p7 = scmp.eq.s32.totalorder %s56_s21, 0 }
   0xf   : > { %p720_p8 = por %p73_p5, %p72_p3  ;;  %p104_p10 = scmp.eq.s32.totalorder %s451_s17, 1 }
  0x10   : > { %p724_p9 = por %p98_p6, %p66_p1  ;;  %p482_p13 = scmp.lt.s32.totalorder %s650_s16, 2 }
  0x11   : > { %s729_s24 = scalar_select %p57_p7, %s638_s13, %s59_s19  }
  0x12   : > { %s855_s23 = scalar_select %p724_p9, 1, 0 }
  0x13   : > { %p731_p11 = por %p104_p10, %p72_p3  ;;  %s127_s26 = sand.u32 1, %s638_s13  }
  0x14   : > { %s454_s27 = sshll.u32 %s127_s26, 3  ;;  %s468_s28 = sshll.u32 %s646_s15, 7 }
  0x15   : > { %s856_s25 = scalar_select %p731_p11, 1, 0 }
  0x16   : > { %s742_s3 = scalar_lea.hbm %s850_s1, %s468_s28  ;;  %s131_s4 = scalar_lea.vmem [#allocation3], %s454_s27 }
  0x17   : > { %s139_s5 = sshll.u32 %s131_s4, 4  ;;  %p748_p0 = pnand %p482_p13, %p714_p4  ;;  %s744_s5 = int_to_ptr.vmem [resolvable:$true] %s139_s5 }
  0x18   : > { %s128_s7 = scalar_lea.sflag [#allocation4], %s127_s26  ;;  %s538_s8 = scalar_lea.hbm %s742_s3, 128 }
  0x19   : > { %p539_p3 = scmp.ne.s32.totalorder %s742_s3, %s538_s8  ;;  %p540_p5 = pneg %p748_p0 }
  0x1a   : > { %s543_s0 = scalar_lea.hbm %s850_s1, 256  ;;  %p544_p4 = scmp.lt.u32.totalorder %s742_s3, %s850_s1 }
  0x1b   : > { %p541_p6 = pnand %p540_p5, %p539_p3  ;;  %p545_p10 = scmp.lt.u32.totalorder %s543_s0, %s538_s8 }
  0x1c   : > { %p547_p12 = scmp.lt.u32.totalorder %s538_s8, %s742_s3 }
  0x1d   : > { %p542_p7 = pneg %p541_p6  ;;  %p546_p13 = por %p545_p10, %p544_p4 }
  0x1f   : > { %p548_p1 = por %p547_p12, %p546_p13 }
  0x21   : > { %p549_p2 = pnand %p548_p1, %p542_p7 }
  0x23   : > { %552 = shalt.err (!%p549_p2)
}
  0x24   : > { %s553_s20 = scalar_lea.vmem %s744_s5, 128  ;;  %s652_s21 = smov [#allocation3]  }
  0x25   : > { %p554_p3 = scmp.ne.s32.totalorder %s744_s5, %s553_s20  ;;  %s558_s26 = sshll.u32 %s652_s21, 4  ;;  %s559_s26 = int_to_ptr.vmem [resolvable:$false] %s558_s26 }
  0x26   : > { %s560_s27 = scalar_lea.vmem %s559_s26, 256  ;;  %p561_p9 = scmp.lt.s32.totalorder %s744_s5, %s559_s26 }
  0x27   : > { %p556_p6 = pnand %p554_p3, %p540_p5  ;;  %p562_p4 = scmp.lt.s32.totalorder %s560_s27, %s553_s20 }
  0x29   : > { %p557_p11 = pneg %p556_p6  ;;  %p563_p10 = por %p562_p4, %p561_p9 }
  0x2b   : > { %p564_p12 = pnand %p563_p10, %p557_p11 }
  0x2d   : > { %567 = shalt.err (!%p564_p12)
}
  0x2e   : > { %477 = dma.hbm_to_vmem [thread:$0]  (!%p748_p0), %s742_s3, 128, %s744_s5, %s128_s7  }
  0x2f   : > { %p858_p1 = scmp.lt.s32.totalorder %s650_s16, 3  ;;  %p859_p2 = scmp.ge.s32.totalorder %s650_s16, 1 }
  0x31   : > { %p145_p5 = pnand %p859_p2, %p858_p1 }
  0x32   : > { %s784_s28 = sand.u32 (!%p145_p5), 1, %s634_s12  }
  0x33   : > { %148 = sbr.rel (%p145_p5) target bundleno = 825 (0x339), region = 28  ;;  %s458_s29 = sshll.u32 (!%p145_p5), %s784_s28, 3 }
  0x34   : > { %s151_s30 = scalar_lea.sflag (!%p145_p5), [#allocation4], %s784_s28  ;;  %s154_s4 = scalar_lea.vmem (!%p145_p5), [#allocation3], %s458_s29 }
  0x3a   : > { %621 = dma.done.wait (%p720_p8), %s151_s30, 128  }
  0x3b   : > { %623 = vsyncadd (%p720_p8), %s151_s30, 4294967168  ;;  %v175_v0 = vld [vmem:[%s154_s4] sm:$0xff]  ;;  %vm249_vm0 = vcmask 27648   ;;  %vm265_vm1 = vcmask 1043456   ;;  %v653_v10 = vmov 0.0   ;;  %vm261_vm2 = vcmask 31744  }
  0x3c   : > { %v177_v1 = vcombine.high %v175_v0, %v175_v0  ;;  %334 = vmatprep.mubr.f32.mxu1 %v653_v10  ;;  %s341_s22 = sld [smem:[#allocation2]]  ;;  %s469_s3 = sshll.u32 %s642_s14, 7 }
  0x3d   : > { %s174_s5 = scalar_lea.vmem [#allocation6], %s458_s29  ;;  %s800_s9 = scalar_lea.hbm %s851_s2, %s469_s3 }
  0x3e   : > { %179 = vmatprep.subr.mxu0 %v177_v1  ;;  %243 = vmatprep.mubr.f32.mxu0 %v177_v1  ;;  %s369_s6 = sshll.u32 %s174_s5, 4  ;;  %s353_s10 = scalar_lea.sflag [#allocation5], %s784_s28  ;;  %s802_s6 = int_to_ptr.vmem [resolvable:$true] %s369_s6 }
  0x3f   : > { %180 = vmatpush1.xpose.msra.mxu0 %v175_v0  ;;  %460 = vmatprep.subr.msk.mxu1 %vm265_vm1, %v177_v1  ;;  %s568_s0 = scalar_lea.vmem %s802_s6, 128  ;;  %p860_p9 = scmp.ne.s32.totalorder %s855_s23, 0 }
  0x40   : > { %461 = vmatpush1.msk.msra.mxu1 %vm265_vm1, %v175_v0  ;;  %p569_p8 = scmp.ne.s32.totalorder %s802_s6, %s568_s0  ;;  %s654_s14 = smov [#allocation6]  }
  0x41   : > { %s572_s17 = sshll.u32 %s654_s14, 4  ;;  %s573_s17 = int_to_ptr.vmem [resolvable:$false] %s572_s17 }
  0x42   : > { %244 = vmatmul.mubr.f32.vlgmr.msra.gmra.mrb[0].mxu0 %v175_v0  ;;  %v342_v14 = vstv %s341_s22  ;;  %p570_p11 = pnand %p569_p8, %p860_p9  ;;  %s574_s19 = scalar_lea.vmem %s573_s17, 256 }
  0x43   : > { %p575_p7 = scmp.lt.s32.totalorder %s802_s6, %s573_s17  ;;  %p576_p13 = scmp.lt.s32.totalorder %s574_s19, %s568_s0 }
  0x44   : > { %p571_p0 = pneg %p570_p11 }
  0x45   : > { %p577_p3 = por %p576_p13, %p575_p7 }
  0x47   : > { %p578_p6 = pnand %p577_p3, %p571_p0 }
 0x115   : > { %v245_v2 = vpop.f32.mrb[0].mxu0 }
 0x116   : > { %v247_v3 = vpop.f32.mrb[1].mxu0  ;;  %v250_v4 = vsel %vm249_vm0, %v245_v2, inf }
 0x117   : > { %251 = vmin.xlane.f32.xlu0 %v250_v4 }
 0x1a4   : > { %v252_v5 = vpop.xlane.xlu0 %251 }
 0x1a5   : > { %v253_v6 = vsub.f32 %v252_v5, %v245_v2 }
 0x1a7   : > { %v254_v7 = vmul.f32 1.442695, %v253_v6 }
 0x1a9   : > { %534 = vpow2.f32 %v254_v7 }
 0x1b3   : > { %v535_v8 = vpop.eup %534 }
 0x1b4   : > { %v256_v9 = vsel %vm249_vm0, %v535_v8, 0.0 }
 0x1b5   : > { %257 = vadd.xlane.f32.xlu0 %v256_v9 }
 0x242   : > { %v258_v11 = vpop.xlane.xlu0 %257 }
 0x243   : > { %536 = vrcp.f32 %v258_v11 }
 0x24d   : > { %v537_v12 = vpop.eup %536 }
 0x24e   : > { %v260_v13 = vmul.f32 %v537_v12, %v535_v8 }
 0x250   : > { %462 = vmatmul.mubr.msk.f32.vlgmr.msra.gmra.mrb[0].mxu1 %vm261_vm2, %v260_v13 }
 0x323   : > { %v336_v15 = vpop.f32.mrb[0].mxu1 }
 0x324   : > { %v343_v16 = vmul.f32 %v342_v14, %v336_v15  ;;  %v338_v17 = vpop.f32.mrb[1].mxu1 }
 0x325   : > { %v344_v18 = vmul.f32 %v342_v14, %v338_v17 }
 0x326   : > { %v345_v19 = vadd.f32 %v343_v16, %v175_v0 }
 0x327   : > { %v346_v20 = vadd.f32 %v344_v18, %v177_v1 }
 0x329   : > { %v349_v21 = vcombine.low %v345_v19, %v346_v20 }
 0x32b   : > { %351 = vst [vmem:[%s174_s5] sm:$0xff] %v349_v21 }
 0x32c   : > { %581 = shalt.err (!%p578_p6)
}
 0x32d   : > { %s582_s20 = scalar_lea.hbm %s800_s9, 128  ;;  %s586_s27 = scalar_lea.hbm %s851_s2, 256 }
 0x32e   : > { %p583_p4 = scmp.ne.s32.totalorder %s800_s9, %s582_s20  ;;  %p587_p1 = scmp.lt.u32.totalorder %s800_s9, %s851_s2 }
 0x32f   : > { %p588_p2 = scmp.lt.u32.totalorder %s586_s27, %s582_s20  ;;  %p590_p8 = scmp.lt.u32.totalorder %s582_s20, %s800_s9 }
 0x330   : > { %p584_p10 = pnand %p583_p4, %p860_p9 }
 0x331   : > { %p589_p5 = por %p588_p2, %p587_p1 }
 0x332   : > { %p585_p12 = pneg %p584_p10 }
 0x333   : > { %p591_p11 = por %p590_p8, %p589_p5 }
 0x335   : > { %p592_p0 = pnand %p591_p11, %p585_p12 }
 0x337   : > { %595 = shalt.err (!%p592_p0)
}
 0x338   : > { %472 = dma.vmem_to_hbm [thread:$0]  (%p860_p9), %s802_s6, 128, %s800_s9, %s353_s10  }
 0x339 PF: > { %s381_s30 = sand.u32 1, %s630_s11   ;;  %p861_p7 = scmp.ne.s32.totalorder %s856_s25, 0 }
 0x33a   : > { %p862_p13 = scmp.ge.s32.totalorder %s650_s16, 2  ;;  %s382_s4 = scalar_lea.sflag [#allocation5], %s381_s30 }
 0x33c   : > { %p479_p3 = pnand %p862_p13, %p861_p7 }
 0x33e   : > { %625 = dma.done.wait (!%p479_p3), %s382_s4, 128  }
 0x33f   : > { %627 = vsyncadd (!%p479_p3), %s382_s4, 4294967168  ;;  %s19_s16 = sadd.s32 1, %s650_s16   ;;  %s863_s11 = smov %s634_s12 }
 0x340   : > { %p16_p6 = scmp.ge.s32.totalorder %s19_s16, 4   ;;  %s864_s12 = smov %s638_s13 }
 0x341   : > { %s865_s13 = smov %s729_s24  ;;  %s866_s14 = smov %s646_s15 }
 0x342   : > { %s867_s15 = smov %s869_s18  ;;  %18 = sbr.rel (!%p16_p6) target bundleno = 8 (0x8), region = 73 }
 0x349   :  { %387 = vsyncpa [#allocation4], 1 }
 0x34a   :  { %389 = vsyncpa [#allocation4 + $0x1], 1 }
 0x34b   :  { %390 = vsyncpa [#allocation5], 1 }
 0x34c   :  { %392 = vsyncpa [#allocation5 + $0x1], 1 }

</bundles_post_ra>
